<compile_context>
chip_gen: v7x
topology: tpu7x:2x2x1
jax: 0.10.0
libtpu: 0.0.40
codegen_flags: <defaults>
</compile_context>

<pallas_src>
import jax
import jax.numpy as jnp
from jax import lax
from jax.experimental import pallas as pl
from jax.experimental.pallas import tpu as pltpu


def _round_up(x, m):
    return ((x + m - 1) // m) * m


# ----------------------------------------------------------------------------
# Pallas kernel: logits = x @ W^T + b   (nn.Linear(dim, label))
#   x : (tb, dim)    bf16  (class-token features, autocast dtype)
#   W : (L_out, dim) bf16  (native PyTorch (label, dim) layout, maybe padded)
#   b : (1, L_out)   f32
# ----------------------------------------------------------------------------
def _linear_head_kernel(x_ref, w_ref, b_ref, o_ref):
    # bf16 x bf16 on the MXU, f32 accumulation; contraction over the dim axis
    # of both operands (== x @ W^T), so no wrapper-side transpose.
    acc = lax.dot_general(
        x_ref[...], w_ref[...],
        dimension_numbers=(((1,), (1,)), ((), ())),
        preferred_element_type=jnp.float32)          # (tb, L_out) f32
    o_ref[...] = acc + b_ref[...]                    # f32 epilogue (bias add)


def linear_head(features_bf16, weight, bias):
    """features_bf16: (B, dim) bf16; weight: (label, dim) f32 (PyTorch layout);
    bias: (label,) f32  ->  logits (B, label) f32."""
    B, dim = features_bf16.shape
    label = weight.shape[0]

    # bf16 weight for the MXU fast path (accumulation stays f32 in-kernel).
    w = weight.astype(jnp.bfloat16)

    # Lane-dense output only pays once stores dominate (large B); at small B
    # the (B, 5) masked store is noise and the padding would just add ops.
    lane_dense = B >= 1024
    if lane_dense:
        l_out = 128
        w = jnp.pad(w, ((0, l_out - label), (0, 0)))
        b2 = jnp.pad(bias, (0, l_out - label)).astype(jnp.float32).reshape(1, l_out)
    else:
        l_out = label
        b2 = bias.astype(jnp.float32).reshape(1, l_out)

    # Batch tiling:
    #   B < 16   : single full-array block (grid=(1,)), nothing to shard.
    #   B >= 16  : >=2 grid steps (v7x megacore), tile rounded to a sublane
    #              multiple and capped at 2048 rows; remainder zero-padded.
    if B < 16:
        tb = B
        b_pad = B
    else:
        tb = min(2048, _round_up(pl.cdiv(B, 2), 8))
        b_pad = _round_up(B, tb)

    x = features_bf16
    if b_pad != B:
        x = jnp.pad(x, ((0, b_pad - B), (0, 0)))
    grid = (b_pad // tb,)

    # Advisory cost for XLA's scheduler (this call is tiny at B~2).
    flops = 2 * b_pad * dim * l_out
    bytes_accessed = (b_pad * dim * 2          # x (bf16)
                      + l_out * dim * 2        # W (bf16)
                      + l_out * 4              # bias (f32)
                      + b_pad * l_out * 4)     # logits (f32)

    out = pl.pallas_call(
        _linear_head_kernel,
        out_shape=jax.ShapeDtypeStruct((b_pad, l_out), jnp.float32),
        grid_spec=pltpu.PrefetchScalarGridSpec(
            num_scalar_prefetch=0,
            grid=grid,
            in_specs=[
                pl.BlockSpec((tb, dim), lambda i: (i, 0)),        # x tile
                pl.BlockSpec((l_out, dim), lambda i: (0, 0)),     # W resident
                pl.BlockSpec((1, l_out), lambda i: (0, 0)),       # b resident
            ],
            out_specs=pl.BlockSpec((tb, l_out), lambda i: (i, 0)),
        ),
        compiler_params=pltpu.CompilerParams(
            dimension_semantics=("parallel",),        # shard batch tiles (v7x 2 TCs)
            vmem_limit_bytes=32 * 1024 * 1024),       # headroom for tb=2048 on v5e
        cost_estimate=pl.CostEstimate(
            flops=flops, transcendentals=0, bytes_accessed=bytes_accessed),
    )(x, w, b2)

    if b_pad != B or l_out != label:
        out = out[:B, :label]
    return out


# ----------------------------------------------------------------------------
# Stand-in for feature_model.get_intermediate_layers(..., return_class_token=True)
# ----------------------------------------------------------------------------
# TODO(synk): the real ViT backbone is an external module passed to
# ScaleClassifier.__init__ and is not reimplemented here; this deterministic
# stub only reproduces the interface — a (B, dim) class token produced under
# bf16 autocast (kept in bf16; the head kernel consumes bf16 directly).
def feature_model_stub(images, dim):
    B = images.shape[0]
    flat = images.reshape(B, -1)                    # (B, 3*H*W) == (B, dim) here
    assert flat.shape[1] == dim, "stub expects 3*H*W == dim"
    return flat.astype(jnp.bfloat16)                # features[0][1] in the ref


# ----------------------------------------------------------------------------
# Full ScaleClassifier.forward
# ----------------------------------------------------------------------------
def scale_classifier_forward(images, weight, bias, dim=768):
    features_cls = feature_model_stub(images, dim)        # (B, dim) bf16
    return linear_head(features_cls, weight, bias)        # (B, label) f32


def _reference_logits(images, weight, bias, dim):
    """Plain-JAX reference. `kernel_math=True` mirrors the bf16 weight the
    kernel consumes; `kernel_math=False` is the f32-weight module semantics."""
    feats = feature_model_stub(images, dim).astype(jnp.float32)
    ref_kernel = jnp.dot(feats, weight.astype(jnp.bfloat16).astype(jnp.float32).T,
                         precision=lax.Precision.HIGHEST) + bias
    ref_module = jnp.dot(feats, weight.T,
                         precision=lax.Precision.HIGHEST) + bias
    return ref_kernel, ref_module


if __name__ == "__main__":
    DIM, LABEL = 768, 5
    key = jax.random.PRNGKey(0)
    k_img, k_w, k_img2 = jax.random.split(key, 3)

    # nn.Linear(dim, label): weight ~ N(0, 0.01), bias = 0  (as in __init__)
    weight = 0.01 * jax.random.normal(k_w, (LABEL, DIM), dtype=jnp.float32)
    bias = jnp.zeros((LABEL,), dtype=jnp.float32)

    # ---- deployment-like tiny batch: B=2, 3*16*16 == 768 == dim ----
    images = jax.random.normal(k_img, (2, 3, 16, 16), dtype=jnp.float32)
    logits = scale_classifier_forward(images, weight, bias, dim=DIM)
    logits = jax.block_until_ready(logits)
    assert logits.shape == (2, LABEL)

    ref_k, ref_m = _reference_logits(images, weight, bias, DIM)
    # Tight check against the exact math the kernel performs (bf16 W, f32 acc).
    assert jnp.allclose(logits, ref_k, atol=1e-3, rtol=1e-3)
    # Looser check against the f32-weight module semantics (bf16 W rounding).
    assert jnp.allclose(logits, ref_m, atol=5e-3, rtol=1e-2)

    # ---- exercise the tiled / padded path (B=24 -> tb=16, grid=(2,)) ----
    images2 = jax.random.normal(k_img2, (24, 3, 16, 16), dtype=jnp.float32)
    logits2 = scale_classifier_forward(images2, weight, bias, dim=DIM)
    logits2 = jax.block_until_ready(logits2)
    assert logits2.shape == (24, LABEL)

    ref2_k, ref2_m = _reference_logits(images2, weight, bias, DIM)
    assert jnp.allclose(logits2, ref2_k, atol=1e-3, rtol=1e-3)
    assert jnp.allclose(logits2, ref2_m, atol=5e-3, rtol=1e-2)

    print("KERNEL_OK")
</pallas_src>

<mosaic_0001>
module attributes {stable_mosaic.version = 11 : i64} {
  func.func @_linear_head_kernel(%arg0: i32, %arg1: memref<2x768xbf16, #tpu.memory_space<vmem>>, %arg2: memref<5x768xbf16, #tpu.memory_space<vmem>>, %arg3: memref<1x5xf32, #tpu.memory_space<vmem>>, %arg4: memref<2x5xf32, #tpu.memory_space<vmem>>) attributes {dimension_semantics = [#tpu.dimension_semantics<parallel>], iteration_bounds = array<i64: 1>, scalar_prefetch = 0 : i64, scratch_operands = 0 : i64, tpu.core_type = #tpu.core_type<tc>, window_params = [{transform_indices = @transform_0, window_bounds = array<i64: 2, 768>}, {pipeline_mode = #tpu.pipeline_mode<synchronous>, transform_indices = @transform_1, window_bounds = array<i64: 5, 768>}, {pipeline_mode = #tpu.pipeline_mode<synchronous>, transform_indices = @transform_2, window_bounds = array<i64: 1, 5>}, {transform_indices = @transform_3, window_bounds = array<i64: 2, 5>}]} {
    %c0 = arith.constant 0 : index
    %c0_0 = arith.constant 0 : index
    %0 = vector.load %arg1[%c0, %c0_0] : memref<2x768xbf16, #tpu.memory_space<vmem>>, vector<2x768xbf16>
    %c0_1 = arith.constant 0 : index
    %c0_2 = arith.constant 0 : index
    %1 = vector.load %arg2[%c0_1, %c0_2] : memref<5x768xbf16, #tpu.memory_space<vmem>>, vector<5x768xbf16>
    %cst = arith.constant dense<0.000000e+00> : vector<2x5xf32>
    %2 = tpu.matmul %0, %1, %cst {dimension_numbers = #tpu.dot_dimension_numbers<[1], [1], [0], [0], [0, 0, 1, 0], [], []>} : vector<2x768xbf16>, vector<5x768xbf16>, vector<2x5xf32> -> vector<2x5xf32>
    %c0_3 = arith.constant 0 : index
    %c0_4 = arith.constant 0 : index
    %3 = vector.load %arg3[%c0_3, %c0_4] : memref<1x5xf32, #tpu.memory_space<vmem>>, vector<1x5xf32>
    %4 = vector.broadcast %3 : vector<1x5xf32> to vector<2x5xf32>
    %5 = arith.addf %2, %4 : vector<2x5xf32>
    %c0_5 = arith.constant 0 : index
    %c0_6 = arith.constant 0 : index
    %6 = vector.load %arg4[%c0_5, %c0_6] : memref<2x5xf32, #tpu.memory_space<vmem>>, vector<2x5xf32>
    tpu.vector_store %arg4[%c0_5, %c0_6], %5 {strides = array<i32>} : memref<2x5xf32, #tpu.memory_space<vmem>>, vector<2x5xf32>,
    return
  }
  func.func @transform_0(%arg0: i32) -> (i32, i32) {
    %c0_i32 = arith.constant 0 : i32
    %c0_i32_0 = arith.constant 0 : i32
    return %arg0, %c0_i32 : i32, i32
  }
  func.func @transform_1(%arg0: i32) -> (i32, i32) {
    %c0_i32 = arith.constant 0 : i32
    %c0_i32_0 = arith.constant 0 : i32
    %c0_i32_1 = arith.constant 0 : i32
    return %c0_i32, %c0_i32_0 : i32, i32
  }
  func.func @transform_2(%arg0: i32) -> (i32, i32) {
    %c0_i32 = arith.constant 0 : i32
    %c0_i32_0 = arith.constant 0 : i32
    %c0_i32_1 = arith.constant 0 : i32
    return %c0_i32, %c0_i32_0 : i32, i32
  }
  func.func @transform_3(%arg0: i32) -> (i32, i32) {
    %c0_i32 = arith.constant 0 : i32
    %c0_i32_0 = arith.constant 0 : i32
    return %arg0, %c0_i32 : i32, i32
  }
}

</mosaic_0001>

<bundles_post_ra>
// kernel: tpu_custom_call.1
= control target key start
LH: loop header
LB: loop body
LE: loop exit
PB: predicated region body
PF: predicated region fallthrough
CT: control target
= control target key end

     0   :  { %8 = vsyncpa [#allocation3], 0  ;;  %s423_s0 = inlined_call_operand.hbm [shape: bf16[2,768], index: 0, kind: input, shape index: {}]   ;;  %s424_s1 = inlined_call_operand.hbm [shape: bf16[5,768], index: 1, kind: input, shape index: {}]   ;;  %s425_s2 = inlined_call_operand.vmem [shape: f32[1,5], index: 2, kind: input, shape index: {}]   ;;  %s426_s3 = inlined_call_operand.hbm [shape: f32[2,5], index: 3, kind: output, shape index: {}]  }
   0x1   :  { %9 = vsyncpa [#allocation6], 0 }
   0x2   :  { %10 = vsyncpa [#allocation4], 0  ;;  %s360_s12 = smov [#allocation2]   ;;  %s361_s14 = smov [#allocation5]  }
   0x3   :  { %s17_s13 = sshll.u32 %s360_s12, 4  ;;  %s27_s15 = sshll.u32 %s361_s14, 4  ;;  %s18_s13 = int_to_ptr.vmem [resolvable:$true] %s17_s13  ;;  %s28_s15 = int_to_ptr.vmem [resolvable:$true] %s27_s15 }
   0x4   :  { %s288_s18 = scalar_lea.hbm %s423_s0, 96 }
   0x5   :  { %p289_p0 = scmp.ne.s32.totalorder %s423_s0, %s288_s18  ;;  %p292_p1 = scmp.lt.u32.totalorder %s288_s18, %s423_s0 }
   0x7   :  { %p294_p2 = pnand %p292_p1, %p289_p0 }
   0x9   :  { %297 = shalt.err (!%p294_p2)
}
   0xa   :  { %s298_s23 = scalar_lea.vmem %s18_s13, 96  ;;  %p303_p4 = scmp.lt.s32.totalorder %s18_s13, %s18_s13 }
   0xb   :  { %p299_p3 = scmp.ne.s32.totalorder %s18_s13, %s298_s23  ;;  %p304_p5 = scmp.lt.s32.totalorder %s298_s23, %s298_s23 }
   0xd   :  { %p305_p6 = por %p304_p5, %p303_p4 }
   0xf   :  { %p306_p7 = pnand %p305_p6, %p299_p3 }
  0x11   :  { %309 = shalt.err (!%p306_p7)
}
  0x12   :  { %20 = dma.hbm_to_vmem [thread:$0]  %s423_s0, 96, %s18_s13, [#allocation3]  }
  0x13   :  { %s310_s28 = scalar_lea.hbm %s424_s1, 384 }
  0x14   :  { %p311_p8 = scmp.ne.s32.totalorder %s424_s1, %s310_s28  ;;  %p314_p9 = scmp.lt.u32.totalorder %s310_s28, %s424_s1 }
  0x16   :  { %p316_p10 = pnand %p314_p9, %p311_p8 }
  0x18   :  { %319 = shalt.err (!%p316_p10)
}
  0x19   :  { %s320_s6 = scalar_lea.vmem %s28_s15, 384  ;;  %p325_p12 = scmp.lt.s32.totalorder %s28_s15, %s28_s15 }
  0x1a   :  { %p321_p11 = scmp.ne.s32.totalorder %s28_s15, %s320_s6  ;;  %p326_p13 = scmp.lt.s32.totalorder %s320_s6, %s320_s6 }
  0x1c   :  { %p327_p0 = por %p326_p13, %p325_p12 }
  0x1e   :  { %p328_p1 = pnand %p327_p0, %p321_p11 }
  0x20   :  { %331 = shalt.err (!%p328_p1)
}
  0x21   :  { %30 = dma.hbm_to_vmem [thread:$0]  %s424_s1, 384, %s28_s15, [#allocation6]  }
  0x22   :  { %354 = dma.done.wait [#allocation3], 96  }
  0x23   :  { %355 = vsyncadd [#allocation3], 4294967200 }
  0x24   :  { %356 = dma.done.wait [#allocation6], 384  }
  0x25   :  { %357 = vsyncadd [#allocation6], 4294966912  ;;  %v56_v0 = vlaneseq  ;;  %v362_v1 = vmov 1966171168   ;;  %v42_v6 = vld [vmem:[#allocation5 + $0x8] sm:$0x77] }
  0x26   :  { %v54_v2 = vunpack.c.l.s4 %v362_v1  ;;  %v40_v7 = vld [vmem:[#allocation2] sm:$0x3f]  ;;  %v41_v8 = vld [vmem:[#allocation5] sm:$0x77]  ;;  %v268_v9 = vcombine.high %v42_v6, %v42_v6  ;;  %v267_v10 = vcombine.low %v42_v6, %v42_v6  ;;  %v43_v13 = vld [vmem:[#allocation5 + $0x10] sm:$0x77] }
  0x27   :  { %v57_v3 = vshrl.u32 %v56_v0, 7  ;;  %v52_v11 = vcombine.high %v40_v7, %v40_v7  ;;  %v266_v14 = vcombine.high %v41_v8, %v41_v8  ;;  %v270_v15 = vcombine.high %v43_v13, %v43_v13  ;;  %v264_v31 = vld [vmem:[%s425_s2] ss:$0 sm:$0xff]  ;;  %s363_s9 = smov [#allocation7]  }
  0x28   :  { %v55_v4 = vunpack.c.0.s8 %v54_v2  ;;  %v265_v16 = vcombine.low %v41_v8, %v41_v8  ;;  %166 = vmatprep.subr.bf16.mxu0 %v268_v9  ;;  %v269_v24 = vcombine.low %v43_v13, %v43_v13  ;;  %s254_s10 = sshll.u32 %s363_s9, 4  ;;  %vm246_vm0 = vcmask 33792   ;;  %s255_s10 = int_to_ptr.vmem [resolvable:$true] %s254_s10 }
  0x29   :  { %167 = vmatpush1.bf16.xpose.msra.mxu0 %v267_v10  ;;  %126 = vmatprep.subr.bf16.mxu1 %v266_v14  ;;  %s332_s11 = scalar_lea.vmem %s255_s10, 32  ;;  %p337_p3 = scmp.lt.s32.totalorder %s255_s10, %s255_s10 }
  0x2a   :  { %v58_v5 = vsub.s32 %v55_v4, %v57_v3  ;;  %206 = vmatprep.subr.bf16.mxu0 %v270_v15  ;;  %127 = vmatpush1.bf16.xpose.msra.mxu1 %v265_v16  ;;  %p333_p2 = scmp.ne.s32.totalorder %s255_s10, %s332_s11  ;;  %p338_p4 = scmp.lt.s32.totalorder %s332_s11, %s332_s11 }
  0x2c   :  { %v59_v12 = vrot.slane %v40_v7, %v58_v5  ;;  %v66_v19 = vrot.slane %v52_v11, %v58_v5  ;;  %p339_p5 = por %p338_p4, %p337_p3 }
  0x2e   :  { %v67_v17 = vcombine.high %v59_v12, %v59_v12  ;;  %v75_v18 = vrot.slane %v59_v12, %v58_v5  ;;  %v68_v21 = vcombine.high %v66_v19, %v66_v19  ;;  %v82_v26 = vrot.slane %v66_v19, %v58_v5  ;;  %p340_p6 = pnand %p339_p5, %p333_p2 }
  0x30   :  { %v89_v20 = vrot.slane %v67_v17, %v58_v5  ;;  %v97_v23 = vcombine.high %v75_v18, %v75_v18  ;;  %v96_v25 = vrot.slane %v68_v21, %v58_v5 }
  0x32   :  { %v98_v22 = vcombine.high %v89_v20, %v89_v20  ;;  %158 = vmatprep.mubr.bf16.mxu1 %v89_v20 }
  0x33   :  { %159 = vmatmul.mubr.bf16.vlgmr.msra.gmra.mrb[0].mxu1 %v75_v18 }
  0x34   :  { %198 = vmatprep.mubr.bf16.mxu0 %v98_v22 }
  0x35   :  { %199 = vmatmul.mubr.bf16.vlgmr.msra.gmra.mrb[0].mxu0 %v97_v23 }
  0x36   :  { %207 = vmatpush1.bf16.xpose.msra.mxu0 %v269_v24  ;;  %238 = vmatprep.mubr.bf16.mxu0 %v96_v25 }
  0x41   :  { %239 = vmatmul.mubr.bf16.vlgmr.msra.gmra.mrb[0].mxu0 %v82_v26 }
 0x106   :  { %v160_v27 = vpop.f32.mrb[0].mxu1 }
 0x107   :  { %v162_v28 = vpop.f32.mrb[1].mxu1  ;;  %v161_v32 = vadd.f32 %v264_v31, %v160_v27 }
 0x108   :  { %v163_v29 = vpop.f32.mrb[2].mxu1 }
 0x109   :  { %v164_v30 = vpop.f32.mrb[3].mxu1 }
 0x114   :  { %v240_v33 = vpop.f32.mrb[0].mxu0 }
 0x115   :  { %v272_v34 = vadd.f32 %v240_v33, %v161_v32  ;;  %v242_v35 = vpop.f32.mrb[1].mxu0 }
 0x116   :  { %v243_v36 = vpop.f32.mrb[2].mxu0 }
 0x117   :  { %v244_v37 = vpop.f32.mrb[3].mxu0  ;;  %247 = vst.msk [vmem:[#allocation7] sm:$0x3] %vm246_vm0, %v272_v34 }
 0x118   :  { %343 = shalt.err (!%p340_p6)
}
 0x119   :  { %s344_s13 = scalar_lea.hbm %s426_s3, 32 }
 0x11a   :  { %p345_p7 = scmp.ne.s32.totalorder %s426_s3, %s344_s13  ;;  %p348_p8 = scmp.lt.u32.totalorder %s344_s13, %s426_s3 }
 0x11c   :  { %p350_p9 = pnand %p348_p8, %p345_p7 }
 0x11e   :  { %353 = shalt.err (!%p350_p9)
}
 0x11f   :  { %257 = dma.vmem_to_hbm [thread:$0]  %s255_s10, 32, %s426_s3, [#allocation4]  }
 0x120   :  { %358 = dma.done.wait [#allocation4], 32  }
 0x121   :  { %359 = vsyncadd [#allocation4], 4294967264 }
 0x122   :  { %261 = vsyncpa [#allocation3], 1 }
 0x123   :  { %262 = vsyncpa [#allocation6], 1 }
 0x124   :  { %263 = vsyncpa [#allocation4], 1 }

</bundles_post_ra>
